<compile_context>
chip_gen: v7x
topology: tpu7x:2x2x1
jax: 0.10.0
libtpu: 0.0.40
codegen_flags: <defaults>
</compile_context>

<pallas_src>
import functools

import jax
import jax.numpy as jnp
import numpy as np
from jax.experimental import pallas as pl
from jax.experimental.pallas import tpu as pltpu

BN_EPS = 1e-5
LANE = 128


def _round_up(x, m):
    return ((x + m - 1) // m) * m


def _pad2(a, rows, cols):
    a = a.astype(jnp.float32)
    return jnp.pad(a, ((0, rows - a.shape[0]), (0, cols - a.shape[1])))


# --------------------------------- kernel -----------------------------------

def _bivae_kernel(x_ref, w0_ref, g_ref, bb_ref, wh_ref, bh_ref, eps_ref,
                  otherT_ref, zms_ref, recon_ref, z_sc, *, k_pad, inv_b):
    # ---- encoder: runs once per branch (first N tile); z kept in VMEM scratch
    @pl.when(pl.program_id(1) == 0)
    def _encode():
        x = x_ref[0]                                        # (B, D_pad), f32

        # fc0 (MXU matmul, f32 accumulation).  NOTE: the Linear bias b0 is
        # dropped -- a bias immediately followed by training-mode BatchNorm
        # cancels exactly (it shifts the batch mean by the same constant and
        # leaves the variance unchanged).
        h = jnp.dot(x, w0_ref[0], preferred_element_type=jnp.float32)

        # BatchNorm1d, training-mode batch statistics (biased variance, like
        # torch), computed in ONE pass over h: var = E[h^2] - E[h]^2.
        # The whole branch batch is resident in this grid step -> global stats.
        s1 = jnp.sum(h, axis=0, keepdims=True)
        s2 = jnp.sum(h * h, axis=0, keepdims=True)
        mean = s1 * inv_b
        var = s2 * inv_b - mean * mean
        h = (h - mean) * jax.lax.rsqrt(var + BN_EPS) * g_ref[0] + bb_ref[0]

        # activation (act_fn='tanh'); dropout treated as identity (see TODO)
        h = jnp.tanh(h)

        # fused latent heads: one (B,H)x(H,2*Kp) matmul.  Each head occupies a
        # full 128-lane slot, so both slices below are vreg-aligned copies.
        heads = jnp.dot(h, wh_ref[0],
                        preferred_element_type=jnp.float32) + bh_ref[0]
        mu = heads[:, :k_pad]
        std = jax.nn.sigmoid(heads[:, k_pad:])

        # reparameterize; eps padded lanes are zero -> padded z lanes are zero
        z = mu + eps_ref[0] * std
        z_sc[...] = z

        # pack z|mu|std into one lane-dense slab (3 x 128 lanes) -> full-width
        # unmasked stores; split back in the wrapper.
        zms_ref[0] = jnp.concatenate([z, mu, std], axis=1)

    # ---- decoder: this grid step's N tile only.
    # sigmoid(z @ other_latent.T); other was pre-transposed & lane-padded in
    # the wrapper, and is streamed tile-by-tile along N.
    recon_ref[0] = jax.nn.sigmoid(
        jnp.dot(z_sc[...], otherT_ref[0], preferred_element_type=jnp.float32))


# --------------------------------- wrapper ----------------------------------

def bivae_forward(branches, tn=128):
    """Fused forward over several BiVAE branches (user / item).

    branches: sequence of (x, params, eps, other_latent) where
      params = (w0, b0, bn_gamma, bn_beta, wmu, bmu, wstd, bstd).
    Returns a list of (z, recon, mu, std), one tuple per branch.
    """
    nb = len(branches)
    B = branches[0][0].shape[0]
    K = branches[0][2].shape[1]
    for x, _, eps, _ in branches:
        assert x.shape[0] == B and eps.shape == (B, K), \
            "fused path requires equal batch size / latent dim across branches"

    D = _round_up(max(x.shape[1] for x, _, _, _ in branches), LANE)
    H = _round_up(max(p[0].shape[1] for _, p, _, _ in branches), LANE)
    Kp = _round_up(K, LANE)                      # each head padded to 128 lanes
    N = _round_up(max(o.shape[0] for _, _, _, o in branches), tn)
    PACK = 3 * Kp
    nN = N // tn

    xs, w0s, gs, bbs, whs, bhs, epss, oths = ([] for _ in range(8))
    for x, (w0, _b0, g, bb, wmu, bmu, wstd, bstd), eps, other in branches:
        # _b0 intentionally unused: it cancels under training-mode BatchNorm.
        xs.append(_pad2(x, B, D))
        w0s.append(_pad2(w0, D, H))              # zero rows for padded x cols
        gs.append(_pad2(g, 1, H))
        bbs.append(_pad2(bb, 1, H))
        whs.append(jnp.concatenate([_pad2(wmu, H, Kp), _pad2(wstd, H, Kp)], axis=1))
        bhs.append(jnp.concatenate([_pad2(bmu, 1, Kp), _pad2(bstd, 1, Kp)], axis=1))
        epss.append(_pad2(eps, B, Kp))
        oths.append(_pad2(other.T, Kp, N))       # pre-transposed, lane-padded

    stack = lambda lst: jnp.stack(lst, axis=0)
    ins = tuple(map(stack, (xs, w0s, gs, bbs, whs, bhs, epss, oths)))

    def whole(a):
        # whole-array block per branch, constant across the N axis (resident)
        return pl.BlockSpec((1,) + a.shape[1:], lambda b, j: (b, 0, 0))

    in_specs = [whole(a) for a in ins[:-1]]
    in_specs.append(pl.BlockSpec((1, Kp, tn), lambda b, j: (b, 0, j)))   # otherT

    out_shapes = (
        jax.ShapeDtypeStruct((nb, B, PACK), jnp.float32),  # packed z|mu|std
        jax.ShapeDtypeStruct((nb, B, N), jnp.float32),     # padded reconstruction
    )
    out_specs = (
        pl.BlockSpec((1, B, PACK), lambda b, j: (b, 0, 0)),  # resident across N
        pl.BlockSpec((1, B, tn), lambda b, j: (b, 0, j)),
    )

    flops = 2 * nb * B * (D * H + H * 2 * Kp + Kp * N)
    transcendentals = nb * B * (H + Kp + N)          # tanh + sigmoid(std) + sigmoid(rec)
    bytes_accessed = 4 * (sum(int(np.prod(a.shape)) for a in ins)
                          + nb * B * (PACK + N))

    zms, recon = pl.pallas_call(
        functools.partial(_bivae_kernel, k_pad=Kp, inv_b=1.0 / B),
        grid=(nb, nN),
        out_shape=out_shapes,
        in_specs=in_specs,
        out_specs=out_specs,
        scratch_shapes=[pltpu.VMEM((B, Kp), jnp.float32)],   # z, persists over N
        compiler_params=pltpu.CompilerParams(
            # branch axis -> both TensorCores on v7x; N axis serial (scratch carry)
            dimension_semantics=("parallel", "arbitrary"),
            vmem_limit_bytes=32 * 1024 * 1024),
        cost_estimate=pl.CostEstimate(
            flops=flops, transcendentals=transcendentals,
            bytes_accessed=bytes_accessed),
    )(*ins)

    outs = []
    for bi, (_, _, _, other) in enumerate(branches):
        n_other = other.shape[0]
        z = zms[bi, :, :K]
        mu = zms[bi, :, Kp:Kp + K]
        std = zms[bi, :, 2 * Kp:2 * Kp + K]
        rec = recon[bi, :, :n_other]
        outs.append((z, rec, mu, std))
    return outs


# ----------------------- deterministic parameter setup -----------------------

def _init_linear(key, fan_in, fan_out):
    # matches torch.nn.Linear default init: U(+-1/sqrt(fan_in))
    kw, kb = jax.random.split(key)
    bound = 1.0 / float(np.sqrt(fan_in))
    w = jax.random.uniform(kw, (fan_in, fan_out), jnp.float32, -bound, bound)
    b = jax.random.uniform(kb, (1, fan_out), jnp.float32, -bound, bound)
    return w, b


def _init_branch_params(key, in_dim, hidden, k):
    k0, k1, k2 = jax.random.split(key, 3)
    w0, b0 = _init_linear(k0, in_dim, hidden)
    g = jnp.ones((1, hidden), jnp.float32)    # BN gamma
    bb = jnp.zeros((1, hidden), jnp.float32)  # BN beta
    wmu, bmu = _init_linear(k1, hidden, k)
    wstd, bstd = _init_linear(k2, hidden, k)
    return (w0, b0, g, bb, wmu, bmu, wstd, bstd)


def _ref_branch(x, params, eps, other):
    # faithful two-pass reference (includes b0, like the torch module)
    w0, b0, g, bb, wmu, bmu, wstd, bstd = params
    h = x @ w0 + b0
    mean = h.mean(0, keepdims=True)
    var = ((h - mean) ** 2).mean(0, keepdims=True)
    h = (h - mean) / jnp.sqrt(var + BN_EPS) * g + bb
    h = jnp.tanh(h)
    mu = h @ wmu + bmu
    std = jax.nn.sigmoid(h @ wstd + bstd)
    z = mu + eps * std
    recon = jax.nn.sigmoid(z @ other.T)
    return z, recon, mu, std


if __name__ == "__main__":
    key = jax.random.PRNGKey(0)
    K = 16
    # user_encoder=[n_items, hidden], item_encoder=[n_users, hidden]
    N_ITEMS, N_USERS, HIDDEN = 300, 160, 48   # exercises D/H/N padding + 3 N-tiles
    B = 8

    ks = jax.random.split(key, 8)
    user_params = _init_branch_params(ks[0], N_ITEMS, HIDDEN, K)
    item_params = _init_branch_params(ks[1], N_USERS, HIDDEN, K)

    # latent matrices (self.beta: (n_items, k), self.theta: (n_users, k))
    bound_k = 1.0 / float(np.sqrt(K))
    beta = jax.random.uniform(ks[2], (N_ITEMS, K), jnp.float32, -bound_k, bound_k)
    theta = jax.random.uniform(ks[3], (N_USERS, K), jnp.float32, -bound_k, bound_k)

    # binary interaction matrices
    x_user = (jax.random.uniform(ks[4], (B, N_ITEMS)) < 0.3).astype(jnp.float32)
    x_item = (jax.random.uniform(ks[5], (B, N_USERS)) < 0.3).astype(jnp.float32)

    # reparameterization noise
    eps_u = jax.random.normal(ks[6], (B, K), dtype=jnp.float32)
    eps_i = jax.random.normal(ks[7], (B, K), dtype=jnp.float32)

    branches = [
        (x_user, user_params, eps_u, beta),    # forward(x, user=True,  beta=beta)
        (x_item, item_params, eps_i, theta),   # forward(x, user=False, theta=theta)
    ]
    outs = jax.block_until_ready(bivae_forward(branches))

    # verify against pure-JAX reference (full-precision matmuls, like torch f32)
    with jax.default_matmul_precision("highest"):
        refs = [_ref_branch(x_user, user_params, eps_u, beta),
                _ref_branch(x_item, item_params, eps_i, theta)]
        refs = jax.block_until_ready(refs)
    for got_branch, ref_branch in zip(outs, refs):
        for got, want in zip(got_branch, ref_branch):
            np.testing.assert_allclose(np.asarray(got), np.asarray(want),
                                       atol=1e-5, rtol=1e-5)

    print("KERNEL_OK")
</pallas_src>

<mosaic_0001>
module attributes {stable_mosaic.version = 11 : i64} {
  func.func @_bivae_kernel(%arg0: i32, %arg1: i32, %arg2: memref<1x8x384xf32, #tpu.memory_space<vmem>>, %arg3: memref<1x384x128xf32, #tpu.memory_space<vmem>>, %arg4: memref<1x1x128xf32, #tpu.memory_space<vmem>>, %arg5: memref<1x1x128xf32, #tpu.memory_space<vmem>>, %arg6: memref<1x128x256xf32, #tpu.memory_space<vmem>>, %arg7: memref<1x1x256xf32, #tpu.memory_space<vmem>>, %arg8: memref<1x8x128xf32, #tpu.memory_space<vmem>>, %arg9: memref<1x128x128xf32, #tpu.memory_space<vmem>>, %arg10: memref<1x8x384xf32, #tpu.memory_space<vmem>>, %arg11: memref<1x8x128xf32, #tpu.memory_space<vmem>>, %arg12: memref<8x128xf32, #tpu.memory_space<vmem>>) attributes {dimension_semantics = [#tpu.dimension_semantics<parallel>, #tpu.dimension_semantics<arbitrary>], iteration_bounds = array<i64: 2, 3>, scalar_prefetch = 0 : i64, scratch_operands = 1 : i64, tpu.core_type = #tpu.core_type<tc>, window_params = [{transform_indices = @transform_0, window_bounds = array<i64: 1, 8, 384>}, {transform_indices = @transform_1, window_bounds = array<i64: 1, 384, 128>}, {transform_indices = @transform_2, window_bounds = array<i64: 1, 1, 128>}, {transform_indices = @transform_3, window_bounds = array<i64: 1, 1, 128>}, {transform_indices = @transform_4, window_bounds = array<i64: 1, 128, 256>}, {transform_indices = @transform_5, window_bounds = array<i64: 1, 1, 256>}, {transform_indices = @transform_6, window_bounds = array<i64: 1, 8, 128>}, {transform_indices = @transform_7, window_bounds = array<i64: 1, 128, 128>}, {transform_indices = @transform_8, window_bounds = array<i64: 1, 8, 384>}, {transform_indices = @transform_9, window_bounds = array<i64: 1, 8, 128>}]} {
    %c0_i32 = arith.constant 0 : i32
    %0 = arith.cmpi eq, %arg1, %c0_i32 : i32
    %1 = arith.extui %0 : i1 to i32
    %c0_i32_0 = arith.constant 0 : i32
    %2 = arith.cmpi ne, %1, %c0_i32_0 : i32
    scf.if %2 {
      %c0_9 = arith.constant 0 : index
      %c0_10 = arith.constant 0 : index
      %c0_11 = arith.constant 0 : index
      %15 = vector.load %arg2[%c0_9, %c0_10, %c0_11] : memref<1x8x384xf32, #tpu.memory_space<vmem>>, vector<1x8x384xf32>
      %16 = vector.shape_cast %15 : vector<1x8x384xf32> to vector<8x384xf32>
      %c0_12 = arith.constant 0 : index
      %c0_13 = arith.constant 0 : index
      %c0_14 = arith.constant 0 : index
      %17 = vector.load %arg3[%c0_12, %c0_13, %c0_14] : memref<1x384x128xf32, #tpu.memory_space<vmem>>, vector<1x384x128xf32>
      %18 = vector.shape_cast %17 : vector<1x384x128xf32> to vector<384x128xf32>
      %cst_15 = arith.constant dense<0.000000e+00> : vector<8x128xf32>
      %19 = tpu.matmul %16, %18, %cst_15 {dimension_numbers = #tpu.dot_dimension_numbers<[1], [0], [0], [1], [0, 0, 1, 1], [], []>} : vector<8x384xf32>, vector<384x128xf32>, vector<8x128xf32> -> vector<8x128xf32>
      %cst_16 = arith.constant dense<0.000000e+00> : vector<128xf32>
      %20 = vector.multi_reduction <add>, %19, %cst_16 [0] : vector<8x128xf32> to vector<128xf32>
      %21 = vector.shape_cast %20 : vector<128xf32> to vector<1x128xf32>
      %22 = arith.mulf %19, %19 : vector<8x128xf32>
      %cst_17 = arith.constant dense<0.000000e+00> : vector<128xf32>
      %23 = vector.multi_reduction <add>, %22, %cst_17 [0] : vector<8x128xf32> to vector<128xf32>
      %24 = vector.shape_cast %23 : vector<128xf32> to vector<1x128xf32>
      %cst_18 = arith.constant 1.250000e-01 : f32
      %25 = vector.broadcast %cst_18 : f32 to vector<1x128xf32>
      %26 = arith.mulf %21, %25 : vector<1x128xf32>
      %cst_19 = arith.constant 1.250000e-01 : f32
      %27 = vector.broadcast %cst_19 : f32 to vector<1x128xf32>
      %28 = arith.mulf %24, %27 : vector<1x128xf32>
      %29 = arith.mulf %26, %26 : vector<1x128xf32>
      %30 = arith.subf %28, %29 : vector<1x128xf32>
      %31 = vector.broadcast %26 : vector<1x128xf32> to vector<8x128xf32>
      %32 = arith.subf %19, %31 : vector<8x128xf32>
      %cst_20 = arith.constant 9.99999974E-6 : f32
      %33 = vector.broadcast %cst_20 : f32 to vector<1x128xf32>
      %34 = arith.addf %30, %33 : vector<1x128xf32>
      %35 = math.rsqrt %34 : vector<1x128xf32>
      %36 = vector.broadcast %35 : vector<1x128xf32> to vector<8x128xf32>
      %37 = arith.mulf %32, %36 : vector<8x128xf32>
      %c0_21 = arith.constant 0 : index
      %c0_22 = arith.constant 0 : index
      %c0_23 = arith.constant 0 : index
      %38 = vector.load %arg4[%c0_21, %c0_22, %c0_23] : memref<1x1x128xf32, #tpu.memory_space<vmem>>, vector<1x1x128xf32>
      %39 = vector.shape_cast %38 : vector<1x1x128xf32> to vector<1x128xf32>
      %40 = vector.broadcast %39 : vector<1x128xf32> to vector<8x128xf32>
      %41 = arith.mulf %37, %40 : vector<8x128xf32>
      %c0_24 = arith.constant 0 : index
      %c0_25 = arith.constant 0 : index
      %c0_26 = arith.constant 0 : index
      %42 = vector.load %arg5[%c0_24, %c0_25, %c0_26] : memref<1x1x128xf32, #tpu.memory_space<vmem>>, vector<1x1x128xf32>
      %43 = vector.shape_cast %42 : vector<1x1x128xf32> to vector<1x128xf32>
      %44 = vector.broadcast %43 : vector<1x128xf32> to vector<8x128xf32>
      %45 = arith.addf %41, %44 : vector<8x128xf32>
      %46 = math.tanh %45 : vector<8x128xf32>
      %c0_27 = arith.constant 0 : index
      %c0_28 = arith.constant 0 : index
      %c0_29 = arith.constant 0 : index
      %47 = vector.load %arg6[%c0_27, %c0_28, %c0_29] : memref<1x128x256xf32, #tpu.memory_space<vmem>>, vector<1x128x256xf32>
      %48 = vector.shape_cast %47 : vector<1x128x256xf32> to vector<128x256xf32>
      %cst_30 = arith.constant dense<0.000000e+00> : vector<8x256xf32>
      %49 = tpu.matmul %46, %48, %cst_30 {dimension_numbers = #tpu.dot_dimension_numbers<[1], [0], [0], [1], [0, 0, 1, 1], [], []>} : vector<8x128xf32>, vector<128x256xf32>, vector<8x256xf32> -> vector<8x256xf32>
      %c0_31 = arith.constant 0 : index
      %c0_32 = arith.constant 0 : index
      %c0_33 = arith.constant 0 : index
      %50 = vector.load %arg7[%c0_31, %c0_32, %c0_33] : memref<1x1x256xf32, #tpu.memory_space<vmem>>, vector<1x1x256xf32>
      %51 = vector.shape_cast %50 : vector<1x1x256xf32> to vector<1x256xf32>
      %52 = vector.broadcast %51 : vector<1x256xf32> to vector<8x256xf32>
      %53 = arith.addf %49, %52 : vector<8x256xf32>
      %54 = vector.extract_strided_slice %53 {offsets = [0, 0], sizes = [8, 128], strides = [1, 1]} : vector<8x256xf32> to vector<8x128xf32>
      %55 = vector.extract_strided_slice %53 {offsets = [0, 128], sizes = [8, 128], strides = [1, 1]} : vector<8x256xf32> to vector<8x128xf32>
      %56 = arith.negf %55 : vector<8x128xf32>
      %57 = math.exp %56 : vector<8x128xf32>
      %cst_34 = arith.constant 1.000000e+00 : f32
      %58 = vector.broadcast %cst_34 : f32 to vector<8x128xf32>
      %59 = arith.addf %58, %57 : vector<8x128xf32>
      %60 = arith.divf %58, %59 : vector<8x128xf32>
      %c0_35 = arith.constant 0 : index
      %c0_36 = arith.constant 0 : index
      %c0_37 = arith.constant 0 : index
      %61 = vector.load %arg8[%c0_35, %c0_36, %c0_37] : memref<1x8x128xf32, #tpu.memory_space<vmem>>, vector<1x8x128xf32>
      %62 = vector.shape_cast %61 : vector<1x8x128xf32> to vector<8x128xf32>
      %63 = arith.mulf %62, %60 : vector<8x128xf32>
      %64 = arith.addf %54, %63 : vector<8x128xf32>
      %c0_38 = arith.constant 0 : index
      %c0_39 = arith.constant 0 : index
      %65 = vector.load %arg12[%c0_38, %c0_39] : memref<8x128xf32, #tpu.memory_space<vmem>>, vector<8x128xf32>
      tpu.vector_store %arg12[%c0_38, %c0_39], %64 {strides = array<i32>} : memref<8x128xf32, #tpu.memory_space<vmem>>, vector<8x128xf32>,
      %66 = tpu.concatenate %64, %54, %60 in 1 : vector<8x128xf32>, vector<8x128xf32>, vector<8x128xf32> -> vector<8x384xf32>
      %c0_40 = arith.constant 0 : index
      %c0_41 = arith.constant 0 : index
      %c0_42 = arith.constant 0 : index
      %67 = vector.load %arg10[%c0_40, %c0_41, %c0_42] : memref<1x8x384xf32, #tpu.memory_space<vmem>>, vector<1x8x384xf32>
      %68 = vector.shape_cast %67 : vector<1x8x384xf32> to vector<8x384xf32>
      %69 = vector.shape_cast %66 : vector<8x384xf32> to vector<1x8x384xf32>
      tpu.vector_store %arg10[%c0_40, %c0_41, %c0_42], %69 {strides = array<i32>} : memref<1x8x384xf32, #tpu.memory_space<vmem>>, vector<1x8x384xf32>,
    } else {
    }
    %c0 = arith.constant 0 : index
    %c0_1 = arith.constant 0 : index
    %3 = vector.load %arg12[%c0, %c0_1] : memref<8x128xf32, #tpu.memory_space<vmem>>, vector<8x128xf32>
    %c0_2 = arith.constant 0 : index
    %c0_3 = arith.constant 0 : index
    %c0_4 = arith.constant 0 : index
    %4 = vector.load %arg9[%c0_2, %c0_3, %c0_4] : memref<1x128x128xf32, #tpu.memory_space<vmem>>, vector<1x128x128xf32>
    %5 = vector.shape_cast %4 : vector<1x128x128xf32> to vector<128x128xf32>
    %cst = arith.constant dense<0.000000e+00> : vector<8x128xf32>
    %6 = tpu.matmul %3, %5, %cst {dimension_numbers = #tpu.dot_dimension_numbers<[1], [0], [0], [1], [0, 0, 1, 1], [], []>} : vector<8x128xf32>, vector<128x128xf32>, vector<8x128xf32> -> vector<8x128xf32>
    %7 = arith.negf %6 : vector<8x128xf32>
    %8 = math.exp %7 : vector<8x128xf32>
    %cst_5 = arith.constant 1.000000e+00 : f32
    %9 = vector.broadcast %cst_5 : f32 to vector<8x128xf32>
    %10 = arith.addf %9, %8 : vector<8x128xf32>
    %11 = arith.divf %9, %10 : vector<8x128xf32>
    %c0_6 = arith.constant 0 : index
    %c0_7 = arith.constant 0 : index
    %c0_8 = arith.constant 0 : index
    %12 = vector.load %arg11[%c0_6, %c0_7, %c0_8] : memref<1x8x128xf32, #tpu.memory_space<vmem>>, vector<1x8x128xf32>
    %13 = vector.shape_cast %12 : vector<1x8x128xf32> to vector<8x128xf32>
    %14 = vector.shape_cast %11 : vector<8x128xf32> to vector<1x8x128xf32>
    tpu.vector_store %arg11[%c0_6, %c0_7, %c0_8], %14 {strides = array<i32>} : memref<1x8x128xf32, #tpu.memory_space<vmem>>, vector<1x8x128xf32>,
    return
  }
  func.func @transform_0(%arg0: i32, %arg1: i32) -> (i32, i32, i32) {
    %c0_i32 = arith.constant 0 : i32
    %c0_i32_0 = arith.constant 0 : i32
    %c0_i32_1 = arith.constant 0 : i32
    return %arg0, %c0_i32, %c0_i32_0 : i32, i32, i32
  }
  func.func @transform_1(%arg0: i32, %arg1: i32) -> (i32, i32, i32) {
    %c0_i32 = arith.constant 0 : i32
    %c0_i32_0 = arith.constant 0 : i32
    %c0_i32_1 = arith.constant 0 : i32
    return %arg0, %c0_i32, %c0_i32_0 : i32, i32, i32
  }
  func.func @transform_2(%arg0: i32, %arg1: i32) -> (i32, i32, i32) {
    %c0_i32 = arith.constant 0 : i32
    %c0_i32_0 = arith.constant 0 : i32
    %c0_i32_1 = arith.constant 0 : i32
    return %arg0, %c0_i32, %c0_i32_0 : i32, i32, i32
  }
  func.func @transform_3(%arg0: i32, %arg1: i32) -> (i32, i32, i32) {
    %c0_i32 = arith.constant 0 : i32
    %c0_i32_0 = arith.constant 0 : i32
    %c0_i32_1 = arith.constant 0 : i32
    return %arg0, %c0_i32, %c0_i32_0 : i32, i32, i32
  }
  func.func @transform_4(%arg0: i32, %arg1: i32) -> (i32, i32, i32) {
    %c0_i32 = arith.constant 0 : i32
    %c0_i32_0 = arith.constant 0 : i32
    %c0_i32_1 = arith.constant 0 : i32
    return %arg0, %c0_i32, %c0_i32_0 : i32, i32, i32
  }
  func.func @transform_5(%arg0: i32, %arg1: i32) -> (i32, i32, i32) {
    %c0_i32 = arith.constant 0 : i32
    %c0_i32_0 = arith.constant 0 : i32
    %c0_i32_1 = arith.constant 0 : i32
    return %arg0, %c0_i32, %c0_i32_0 : i32, i32, i32
  }
  func.func @transform_6(%arg0: i32, %arg1: i32) -> (i32, i32, i32) {
    %c0_i32 = arith.constant 0 : i32
    %c0_i32_0 = arith.constant 0 : i32
    %c0_i32_1 = arith.constant 0 : i32
    return %arg0, %c0_i32, %c0_i32_0 : i32, i32, i32
  }
  func.func @transform_7(%arg0: i32, %arg1: i32) -> (i32, i32, i32) {
    %c0_i32 = arith.constant 0 : i32
    %c0_i32_0 = arith.constant 0 : i32
    return %arg0, %c0_i32, %arg1 : i32, i32, i32
  }
  func.func @transform_8(%arg0: i32, %arg1: i32) -> (i32, i32, i32) {
    %c0_i32 = arith.constant 0 : i32
    %c0_i32_0 = arith.constant 0 : i32
    %c0_i32_1 = arith.constant 0 : i32
    return %arg0, %c0_i32, %c0_i32_0 : i32, i32, i32
  }
  func.func @transform_9(%arg0: i32, %arg1: i32) -> (i32, i32, i32) {
    %c0_i32 = arith.constant 0 : i32
    %c0_i32_0 = arith.constant 0 : i32
    return %arg0, %c0_i32, %arg1 : i32, i32, i32
  }
}

</mosaic_0001>

<bundles_post_ra>
// kernel: tpu_custom_call.1
= control target key start
LH: loop header
LB: loop body
LE: loop exit
PB: predicated region body
PF: predicated region fallthrough
CT: control target
= control target key end

     0   :  { %s2746_s0 = inlined_call_operand.hbm [shape: f32[2,8,384], index: 0, kind: input, shape index: {}]   ;;  %s2747_s1 = inlined_call_operand.hbm [shape: f32[2,384,128], index: 1, kind: input, shape index: {}]   ;;  %s2748_s2 = inlined_call_operand.vmem [shape: f32[2,1,128], index: 2, kind: input, shape index: {}]   ;;  %s2749_s3 = inlined_call_operand.hbm [shape: f32[2,1,128], index: 3, kind: input, shape index: {}]   ;;  %s2750_s4 = inlined_call_operand.hbm [shape: f32[2,128,256], index: 4, kind: input, shape index: {}]   ;;  %s2751_s5 = inlined_call_operand.vmem [shape: f32[2,1,256], index: 5, kind: input, shape index: {}]   ;;  %s2752_s6 = inlined_call_operand.vmem [shape: f32[2,8,128], index: 6, kind: input, shape index: {}]   ;;  %s2753_s7 = inlined_call_operand.hbm [shape: f32[2,128,384], index: 7, kind: input, shape index: {}]   ;;  %s2754_s8 = inlined_call_operand.hbm [shape: f32[2,8,384], index: 8, kind: output, shape index: {0}]   ;;  %s2755_s9 = inlined_call_operand.hbm [shape: f32[2,8,384], index: 9, kind: output, shape index: {1}]  }
   0x1   :  { %2787 = sst [smem:[#allocation36_spill]] %s2746_s0 }
   0x2   :  { %2788 = sst [smem:[#allocation37_spill]] %s2747_s1 }
   0x3   :  { %2789 = sst [smem:[#allocation38_spill]] %s2748_s2 }
   0x4   :  { %2790 = sst [smem:[#allocation39_spill]] %s2749_s3 }
   0x5   :  { %2791 = sst [smem:[#allocation40_spill]] %s2750_s4 }
   0x6   :  { %2792 = sst [smem:[#allocation41_spill]] %s2751_s5 }
   0x7   :  { %2793 = sst [smem:[#allocation42_spill]] %s2752_s6 }
   0x8   :  { %2794 = sst [smem:[#allocation43_spill]] %s2753_s7 }
   0x9   :  { %2795 = sst [smem:[#allocation44_spill]] %s2754_s8 }
   0xa   :  { %2796 = sst [smem:[#allocation45_spill]] %s2755_s9 }
   0xb   :  { %15 = vsyncpa [#allocation4], 0 }
   0xc   :  { %17 = vsyncpa [#allocation4 + $0x1], 0 }
   0xd   :  { %18 = vsyncpa [#allocation7], 0 }
   0xe   :  { %20 = vsyncpa [#allocation7 + $0x1], 0 }
   0xf   :  { %21 = vsyncpa [#allocation10], 0 }
  0x10   :  { %23 = vsyncpa [#allocation10 + $0x1], 0 }
  0x11   :  { %24 = vsyncpa [#allocation5], 0 }
  0x12   :  { %26 = vsyncpa [#allocation5 + $0x1], 0 }
  0x13   :  { %27 = vsyncpa [#allocation14], 0 }
  0x14   :  { %29 = vsyncpa [#allocation14 + $0x1], 0  ;;  %s2121_s30 = smov 0   ;;  %s2123_s10 = smov 0  }
  0x15   :  { %s2125_s11 = smov 0   ;;  %s2127_s12 = smov 0  }
  0x16   :  { %s2129_s13 = smov 0   ;;  %s2131_s14 = smov 0  }
  0x17   :  { %s2133_s15 = smov 0   ;;  %s2135_s16 = smov 0  }
  0x18   :  { %s2137_s17 = smov 0   ;;  %s2139_s18 = smov 0  }
  0x19   :  { %s2141_s19 = smov 0  }
  0x1a LB: > { %2797 = sst [smem:[#allocation21_spill]] %s2023_s12  ;;  %s2177_s20 = sadd.s32 4294967295, %s2051_s19   ;;  %s2051_s19 = sphi %s2141_s19, %s35_s19   ;;  %s2047_s18 = sphi %s2139_s18, %s2871_s18   ;;  %s2043_s17 = sphi %s2137_s17, %s2870_s17   ;;  %s2039_s16 = sphi %s2135_s16, %s2869_s16   ;;  %s2035_s15 = sphi %s2133_s15, %s2868_s15   ;;  %s2031_s14 = sphi %s2131_s14, %s2867_s14   ;;  %s2027_s13 = sphi %s2129_s13, %s2866_s13   ;;  %s2023_s12 = sphi %s2127_s12, %s2865_s12   ;;  %s2019_s11 = sphi %s2125_s11, %s2874_s11   ;;  %s2015_s10 = sphi %s2123_s10, %s2873_s10   ;;  %s2011_s30 = sphi %s2121_s30, %s2872_s30  }
  0x1b   : > { %2798 = sst [smem:[#allocation22_spill]] %s2027_s13  ;;  %s1297_s21 = sadd.s32 4294967294, %s2051_s19  }
  0x1c   : > { %2799 = sst [smem:[#allocation23_spill]] %s2031_s14  ;;  %p61_p0 = scmp.ne.s32.totalorder %s2031_s14, %s2027_s13 }
  0x1d   : > { %2800 = sst [smem:[#allocation24_spill]] %s2035_s15  ;;  %p2765_p1 = scmp.eq.s32.totalorder %s2051_s19, 0 }
  0x1e   : > { %2801 = sst [smem:[#allocation25_spill]] %s2039_s16  ;;  %p67_p2 = scmp.ne.s32.totalorder %s2027_s13, %s2023_s12 }
  0x1f   : > { %2802 = sst [smem:[#allocation26_spill]] %s2043_s17  ;;  %p2764_p3 = scmp.eq.s32.totalorder %s2177_s20, 0 }
  0x20   : > { %2803 = sst [smem:[#allocation27_spill]] %s2047_s18  ;;  %p2763_p4 = scmp.eq.s32.totalorder %s2177_s20, 5 }
  0x21   : > { %p63_p5 = por %p2765_p1, %p61_p0  ;;  %p2190_p6 = scmp.eq.s32.totalorder %s1297_s21, 5 }
  0x22   : > { %p2196_p7 = por %p2764_p3, %p67_p2  ;;  %p2202_p8 = por %p2763_p4, %p61_p0 }
  0x23   : > { %s2804_s23 = scalar_select %p2190_p6, 1, 0 }
  0x24   : > { %s2805_s24 = scalar_select %p2196_p7, 1, 0 }
  0x25   : > { %s2807_s25 = scalar_select %p2202_p8, 1, 0 }
  0x26   : > { %2806 = sst [smem:[#allocation28_spill]] %s2805_s24  ;;  %p2208_p9 = por %p2190_p6, %p67_p2 }
  0x27   : > { %2808 = sst [smem:[#allocation29_spill]] %s2807_s25  ;;  %p2762_p10 = scmp.lt.s32.totalorder %s2051_s19, 6 }
  0x28   : > { %s2809_s26 = scalar_select %p2208_p9, 1, 0 }
  0x29   : > { %s2214_s27 = sand.u32 1, %s2031_s14   ;;  %s2766_s28 = sand.u32 1, %s2051_s19  }
  0x2a   : > { %2810 = sst [smem:[#allocation30_spill]] %s2809_s26  ;;  %s1578_s29 = smul.u32 384, %s2214_s27 }
  0x2b   : > { %p2220_p11 = pnand %p2762_p10, %p63_p5  ;;  %s1579_s22 = smul.u32 6144, %s2047_s18 }
  0x2c   : > { %s352_s12 = scalar_lea.vmem [#allocation6], %s1578_s29  ;;  %s2812_s1 = sld [smem:[#allocation37_spill]] }
  0x2d   : > { %s2811_s21 = scalar_select %p2220_p11, 1, 0 }
  0x2e   : > { %s359_s9 = sshll.u32 %s352_s12, 4  ;;  %s2234_s26 = scalar_lea.sflag [#allocation7], %s2766_s28  ;;  %s2230_s9 = int_to_ptr.vmem [resolvable:$true] %s359_s9 }
  0x2f   : > { %p2240_p13 = pneg %p2220_p11 }
  0x32   : > { %s2228_s15 = scalar_lea.hbm %s2812_s1, %s1579_s22  ;;  %s1740_s22 = scalar_lea.hbm %s2812_s1, 12288 }
  0x33   : > { %s1735_s6 = scalar_lea.hbm %s2228_s15, 6144  ;;  %p1741_p5 = scmp.lt.u32.totalorder %s2228_s15, %s2812_s1 }
  0x34   : > { %p1736_p12 = scmp.ne.s32.totalorder %s2228_s15, %s1735_s6  ;;  %p1742_p10 = scmp.lt.u32.totalorder %s1740_s22, %s1735_s6 }
  0x35   : > { %p1744_p3 = scmp.lt.u32.totalorder %s1735_s6, %s2228_s15 }
  0x36   : > { %p1738_p0 = pnand %p2240_p13, %p1736_p12  ;;  %p1743_p4 = por %p1742_p10, %p1741_p5 }
  0x38   : > { %p1739_p2 = pneg %p1738_p0  ;;  %p1745_p1 = por %p1744_p3, %p1743_p4 }
  0x3a   : > { %p1746_p9 = pnand %p1745_p1, %p1739_p2 }
  0x3c   : > { %1749 = shalt.err (!%p1746_p9)
}
  0x3d   : > { %s1750_s28 = scalar_lea.vmem %s2230_s9, 6144  ;;  %s2053_s8 = smov [#allocation6]  }
  0x3e   : > { %p1751_p12 = scmp.ne.s32.totalorder %s2230_s9, %s1750_s28  ;;  %s1755_s12 = sshll.u32 %s2053_s8, 4  ;;  %s1756_s12 = int_to_ptr.vmem [resolvable:$false] %s1755_s12 }
  0x3f   : > { %s1757_s5 = scalar_lea.vmem %s1756_s12, 12288  ;;  %p1758_p7 = scmp.lt.s32.totalorder %s2230_s9, %s1756_s12 }
  0x40   : > { %p1753_p0 = pnand %p1751_p12, %p2240_p13  ;;  %p1759_p6 = scmp.lt.s32.totalorder %s1757_s5, %s1750_s28 }
  0x42   : > { %p1754_p8 = pneg %p1753_p0  ;;  %p1760_p10 = por %p1759_p6, %p1758_p7 }
  0x44   : > { %p1761_p5 = pnand %p1760_p10, %p1754_p8 }
  0x46   : > { %1764 = shalt.err (!%p1761_p5)
}
  0x47   : > { %s2772_s6 = smov 128   ;;  %s2773_s22 = smov 8  }
  0x48   : > { %1605 = dma.hbm_to_vmem [thread:$0]  (!%p2220_p11), %s2228_s15, 6144, %s2230_s9, %s2234_s26, %s2772_s6, %s2772_s6, %s2773_s22  }
  0x49   : > { %p1308_p1 = scmp.ge.s32.totalorder %s2051_s19, 1  ;;  %p447_p3 = scmp.lt.s32.totalorder %s2051_s19, 7 }
  0x4a   : > { %s1303_s28 = sshll.u32 %s2214_s27, 8  ;;  %s1324_s8 = sshll.u32 %s2047_s18, 12 }
  0x4b   : > { %p2270_p4 = pnand %p1308_p1, %p447_p3  ;;  %s396_s12 = scalar_lea.vmem [#allocation9], %s1303_s28 }
  0x4c   : > { %s403_s5 = sshll.u32 %s396_s12, 4  ;;  %s2816_s4 = sld [smem:[#allocation40_spill]]  ;;  %s2280_s5 = int_to_ptr.vmem [resolvable:$true] %s403_s5 }
  0x4d   : > { %s2814_s25 = scalar_select %p2270_p4, 1, 0 }
  0x4e   : > { %s2817_s9 = sand.u32 1, %s2051_s19  }
  0x4f   : > { %2815 = sst [smem:[#allocation31_spill]] %s2814_s25  ;;  %s2284_s15 = scalar_lea.sflag [#allocation10], %s2817_s9 }
  0x52   : > { %s2278_s16 = scalar_lea.hbm %s2816_s4, %s1324_s8  ;;  %s1770_s1 = scalar_lea.hbm %s2816_s4, 8192 }
  0x53   : > { %s1765_s6 = scalar_lea.hbm %s2278_s16, 4096  ;;  %p1771_p9 = scmp.lt.u32.totalorder %s2278_s16, %s2816_s4 }
  0x54   : > { %p1766_p6 = scmp.ne.s32.totalorder %s2278_s16, %s1765_s6  ;;  %p1772_p2 = scmp.lt.u32.totalorder %s1770_s1, %s1765_s6 }
  0x55   : > { %p1774_p0 = scmp.lt.u32.totalorder %s1765_s6, %s2278_s16 }
  0x56   : > { %p1768_p7 = pnand %p1766_p6, %p2240_p13  ;;  %p1773_p12 = por %p1772_p2, %p1771_p9 }
  0x58   : > { %p1769_p8 = pneg %p1768_p7  ;;  %p1775_p10 = por %p1774_p0, %p1773_p12 }
  0x5a   : > { %p1776_p5 = pnand %p1775_p10, %p1769_p8 }
  0x5c   : > { %1779 = shalt.err (!%p1776_p5)
}
  0x5d   : > { %s1780_s9 = scalar_lea.vmem %s2280_s5, 4096  ;;  %s2056_s28 = smov [#allocation9]  }
  0x5e   : > { %p1781_p1 = scmp.ne.s32.totalorder %s2280_s5, %s1780_s9  ;;  %s1785_s12 = sshll.u32 %s2056_s28, 4  ;;  %s1786_s12 = int_to_ptr.vmem [resolvable:$false] %s1785_s12 }
  0x5f   : > { %s1787_s2 = scalar_lea.vmem %s1786_s12, 8192  ;;  %p1788_p7 = scmp.lt.s32.totalorder %s2280_s5, %s1786_s12 }
  0x60   : > { %p1783_p3 = pnand %p1781_p1, %p2240_p13  ;;  %p1789_p4 = scmp.lt.s32.totalorder %s1787_s2, %s1780_s9 }
  0x62   : > { %p1784_p6 = pneg %p1783_p3  ;;  %p1790_p9 = por %p1789_p4, %p1788_p7 }
  0x64   : > { %p1791_p2 = pnand %p1790_p9, %p1784_p6 }
  0x66   : > { %1794 = shalt.err (!%p1791_p2)
}
  0x67   : > { %s2057_s6 = smov 256   ;;  %s2058_s1 = smov 16  }
  0x68   : > { %1611 = dma.hbm_to_vmem [thread:$0]  (!%p2220_p11), %s2278_s16, 4096, %s2280_s5, %s2284_s15, %s2057_s6, %s2057_s6, %s2058_s1  }
  0x69   : > { %s1576_s8 = smul.u32 24, %s2214_s27  ;;  %s1302_s12 = sshll.u32 %s2047_s18, 4 }
  0x6a   : > { %s1577_s28 = smul.u32 384, %s2047_s18  ;;  %s2818_s0 = sld [smem:[#allocation36_spill]] }
  0x6b   : > { %s333_s4 = scalar_lea.vmem [#allocation3], %s1576_s8  ;;  %s2819_s3 = sld [smem:[#allocation39_spill]] }
  0x6c   : > { %s341_s24 = sshll.u32 %s333_s4, 4  ;;  %s330_s5 = scalar_lea.sflag [#allocation4], %s2214_s27  ;;  %s2316_s24 = int_to_ptr.vmem [resolvable:$true] %s341_s24 }
  0x70   : > { %s2314_s22 = scalar_lea.hbm %s2818_s0, %s1577_s28  ;;  %s1800_s9 = scalar_lea.hbm %s2818_s0, 768 }
  0x71   : > { %s2321_s16 = scalar_lea.hbm %s2819_s3, %s1302_s12  ;;  %s1795_s6 = scalar_lea.hbm %s2314_s22, 384 }
  0x72   : > { %p1796_p4 = scmp.ne.s32.totalorder %s2314_s22, %s1795_s6  ;;  %p1801_p0 = scmp.lt.u32.totalorder %s2314_s22, %s2818_s0 }
  0x73   : > { %p1802_p10 = scmp.lt.u32.totalorder %s1800_s9, %s1795_s6  ;;  %p1804_p1 = scmp.lt.u32.totalorder %s1795_s6, %s2314_s22 }
  0x74   : > { %p1798_p8 = pnand %p1796_p4, %p2240_p13 }
  0x75   : > { %p1803_p5 = por %p1802_p10, %p1801_p0 }
  0x76   : > { %p1799_p12 = pneg %p1798_p8 }
  0x77   : > { %p1805_p3 = por %p1804_p1, %p1803_p5 }
  0x79   : > { %p1806_p6 = pnand %p1805_p3, %p1799_p12 }
  0x7b   : > { %1809 = shalt.err (!%p1806_p6)
}
  0x7c   : > { %s1810_s4 = scalar_lea.vmem %s2316_s24, 384  ;;  %s2059_s13 = smov [#allocation3]  }
  0x7d   : > { %p1811_p7 = scmp.ne.s32.totalorder %s2316_s24, %s1810_s4  ;;  %s1815_s25 = sshll.u32 %s2059_s13, 4  ;;  %s1816_s25 = int_to_ptr.vmem [resolvable:$false] %s1815_s25 }
  0x7e   : > { %s1817_s12 = scalar_lea.vmem %s1816_s25, 768  ;;  %p1818_p4 = scmp.lt.s32.totalorder %s2316_s24, %s1816_s25 }
  0x7f   : > { %p1813_p9 = pnand %p1811_p7, %p2240_p13  ;;  %p1819_p8 = scmp.lt.s32.totalorder %s1817_s12, %s1810_s4 }
  0x81   : > { %p1814_p2 = pneg %p1813_p9  ;;  %p1820_p0 = por %p1819_p8, %p1818_p4 }
  0x83   : > { %p1821_p10 = pnand %p1820_p0, %p1814_p2 }
  0x85   : > { %1824 = shalt.err (!%p1821_p10)
}
  0x86   : > { %1602 = dma.hbm_to_vmem [thread:$0]  (!%p2220_p11), %s2314_s22, 384, %s2316_s24, %s330_s5  }
  0x87   : > { %s378_s6 = scalar_lea.vmem [#allocation8], %s2214_s27  ;;  %s1825_s28 = scalar_lea.hbm %s2321_s16, 16 }
  0x88   : > { %s385_s1 = sshll.u32 %s378_s6, 4  ;;  %p1826_p12 = scmp.ne.s32.totalorder %s2321_s16, %s1825_s28  ;;  %s386_s1 = int_to_ptr.vmem [resolvable:$true] %s385_s1 }
  0x89   : > { %s1830_s8 = scalar_lea.hbm %s2819_s3, 32  ;;  %p1831_p3 = scmp.lt.u32.totalorder %s2321_s16, %s2819_s3 }
  0x8a   : > { %p1828_p5 = pnand %p1826_p12, %p2240_p13  ;;  %p1832_p6 = scmp.lt.u32.totalorder %s1830_s8, %s1825_s28 }
  0x8b   : > { %p1834_p9 = scmp.lt.u32.totalorder %s1825_s28, %s2321_s16 }
  0x8c   : > { %p1829_p1 = pneg %p1828_p5  ;;  %p1833_p7 = por %p1832_p6, %p1831_p3 }
  0x8e   : > { %p1835_p2 = por %p1834_p9, %p1833_p7 }
  0x90   : > { %p1836_p4 = pnand %p1835_p2, %p1829_p1 }
  0x92   : > { %1839 = shalt.err (!%p1836_p4)
}
  0x93   : > { %s1840_s24 = scalar_lea.vmem %s386_s1, 16  ;;  %s2060_s27 = smov [#allocation8]  }
  0x94   : > { %p1841_p8 = scmp.ne.s32.totalorder %s386_s1, %s1840_s24  ;;  %s1845_s22 = sshll.u32 %s2060_s27, 4  ;;  %s1846_s22 = int_to_ptr.vmem [resolvable:$false] %s1845_s22 }
  0x95   : > { %s1847_s5 = scalar_lea.vmem %s1846_s22, 32  ;;  %p1848_p12 = scmp.lt.s32.totalorder %s386_s1, %s1846_s22 }
  0x96   : > { %p1843_p0 = pnand %p1841_p8, %p2240_p13  ;;  %p1849_p5 = scmp.lt.s32.totalorder %s1847_s5, %s1840_s24 }
  0x98   : > { %p1844_p10 = pneg %p1843_p0  ;;  %p1850_p11 = por %p1849_p5, %p1848_p12 }
  0x9a   : > { %p1851_p3 = pnand %p1850_p11, %p1844_p10 }
  0x9c   : > { %1854 = shalt.err (!%p1851_p3)
}
  0x9d   : > { %p2820_p6 = scmp.ne.s32.totalorder %s2811_s21, 0  ;;  %s44_s29 = sadd.s32 1, %s2043_s17 }
  0x9e   : > { %s47_s21 = sadd.s32 1, %s2047_s18  ;;  %p45_p11 = scmp.ge.s32.totalorder %s44_s29, 3 }
  0x9f   : > { %1608 = dma.hbm_to_vmem [thread:$0]  (!%p2820_p6), %s2321_s16, 16, %s386_s1, %s2234_s26  }
  0xa0   : > { %s238_s25 = sadd.s32 1, %s2019_s11  ;;  %p245_p13 = scmp.ne.s32.totalorder %s2019_s11, %s2015_s10 }
  0xa1   : > { %p251_p1 = scmp.ne.s32.totalorder %s2015_s10, %s2011_s30  ;;  %s2876_s29 = smov (%p45_p11, %s44_s29), 0 }
  0xa2   : > { %2821 = sst [smem:[#allocation32_spill]] %s2876_s29  ;;  %s2878_s21 = smov (!%p45_p11, %s47_s21), %s2047_s18 }
  0xa3   : > { %s234_s12 = ssub.s32 %s2043_s17, %s2876_s29  ;;  %p2822_p7 = scmp.eq.s32.totalorder %s2051_s19, 0 }
  0xa4   : > { %p49_p2 = scmp.ge.s32.totalorder %s2878_s21, 2  ;;  %p2824_p4 = scmp.eq.s32.totalorder %s2177_s20, 0 }
  0xa5   : > { %p2378_p9 = por %p245_p13, %p2822_p7  ;;  %p2826_p0 = scmp.eq.s32.totalorder %s2177_s20, 5 }
  0xa6   : > { %p2384_p8 = por %p251_p1, %p2824_p4  ;;  %p2828_p12 = scmp.ne.s32.totalorder %s2804_s23, 0 }
  0xa7   : > { %p2390_p10 = por %p2826_p0, %p245_p13  ;;  %s2880_s21 = smov (%p49_p2, %s2878_s21), 0 }
  0xa8   : > { %p2396_p5 = por %p2828_p12, %p251_p1  ;;  %2831 = sst [smem:[#allocation34_spill]] %s2880_s21 }
  0xa9   : > { %s2827_s6 = scalar_select %p2390_p10, 1, 0 }
  0xaa   : > { %s2829_s1 = scalar_select %p2396_p5, 1, 0 }
  0xab   : > { %s429_s28 = sand.u32 1, %s2019_s11   ;;  %s1580_s9 = smul.u32 48, %s2047_s18 }
  0xac   : > { %2830 = sst [smem:[#allocation33_spill]] %s2829_s1  ;;  %s51_s2 = ssub.s32 %s2047_s18, %s2880_s21 }
  0xad   : > { %s1306_s8 = sshll.u32 %s429_s28, 7  ;;  %p52_p3 = scmp.eq.s32.totalorder %s51_s2, 0 }
  0xae   : > { %s235_s4 = sor.u32 %s234_s12, %s51_s2  ;;  %s2832_s13 = sadd.s32 1, %s2031_s14 }
  0xaf   : > { %p236_p6 = scmp.eq.s32.totalorder %s235_s4, 0  ;;  %s436_s27 = sadd.s32 %s2043_s17, %s1580_s9 }
  0xb0   : > { %s2409_s24 = scalar_select %p52_p3, %s2031_s14, %s2832_s13  }
  0xb1   : > { %s2412_s23 = scalar_select %p236_p6, %s2019_s11, %s238_s25  }
  0xb2   : > { %2833 = sst [smem:[#allocation35_spill]] %s2409_s24  ;;  %s431_s22 = scalar_lea.vmem [#allocation11], %s1306_s8 }
  0xb3   : > { %s439_s5 = sshll.u32 %s431_s22, 4  ;;  %s1307_s0 = sshll.u32 %s436_s27, 7  ;;  %s2415_s5 = int_to_ptr.vmem [resolvable:$true] %s439_s5 }
  0xb4   : > { %s2834_s7 = sld [smem:[#allocation43_spill]]  ;;  %p2835_p11 = scmp.lt.s32.totalorder %s2051_s19, 6 }
  0xb6   : > { %p2426_p13 = pnand %p2835_p11, %p2378_p9 }
  0xb8   : > { %p1857_p7 = pneg %p2426_p13 }
  0xba   : > { %s2420_s1 = scalar_lea.hbm %s2834_s7, %s1307_s0  ;;  %s1860_s29 = scalar_lea.hbm %s2834_s7, 12288 }
  0xbb   : > { %s1855_s12 = scalar_lea.hbm %s2420_s1, 2048  ;;  %p1861_p9 = scmp.lt.u32.totalorder %s2420_s1, %s2834_s7 }
  0xbc   : > { %p1856_p1 = scmp.ne.s32.totalorder %s2420_s1, %s1855_s12  ;;  %p1862_p0 = scmp.lt.u32.totalorder %s1860_s29, %s1855_s12 }
  0xbd   : > { %p1864_p3 = scmp.lt.u32.totalorder %s1855_s12, %s2420_s1 }
  0xbe   : > { %p1858_p2 = pnand %p1857_p7, %p1856_p1  ;;  %p1863_p12 = por %p1862_p0, %p1861_p9 }
  0xc0   : > { %p1859_p4 = pneg %p1858_p2  ;;  %p1865_p6 = por %p1864_p3, %p1863_p12 }
  0xc2   : > { %p1866_p11 = pnand %p1865_p6, %p1859_p4 }
  0xc4   : > { %1869 = shalt.err (!%p1866_p11)
}
  0xc5   : > { %s1870_s9 = scalar_lea.vmem %s2415_s5, 2048  ;;  %s2061_s2 = smov [#allocation11]  }
  0xc6   : > { %p1871_p1 = scmp.ne.s32.totalorder %s2415_s5, %s1870_s9  ;;  %s1875_s8 = sshll.u32 %s2061_s2, 4  ;;  %s1876_s8 = int_to_ptr.vmem [resolvable:$false] %s1875_s8 }
  0xc7   : > { %s1877_s4 = scalar_lea.vmem %s1876_s8, 4096  ;;  %p1878_p10 = scmp.lt.s32.totalorder %s2415_s5, %s1876_s8 }
  0xc8   : > { %p1873_p2 = pnand %p1871_p1, %p1857_p7  ;;  %p1879_p9 = scmp.lt.s32.totalorder %s1877_s4, %s1870_s9 }
  0xca   : > { %p1874_p5 = pneg %p1873_p2  ;;  %p1880_p0 = por %p1879_p9, %p1878_p10 }
  0xcc   : > { %p1881_p12 = pnand %p1880_p0, %p1874_p5 }
  0xce   : > { %1884 = shalt.err (!%p1881_p12)
}
  0xcf   : > { %s2062_s13 = smov 384   ;;  %s2837_s27 = smov 8  }
  0xd0   : > { %s2838_s22 = smov 128   ;;  %s2839_s12 = sld [smem:[#allocation31_spill]] }
  0xd1   : > { %1614 = dma.hbm_to_vmem [thread:$0]  (!%p2426_p13), %s2420_s1, 2048, %s2415_s5, %s2284_s15, %s2062_s13, %s2838_s22, %s2837_s27  }
  0xd6   : > { %p2840_p7 = scmp.ne.s32.totalorder %s2839_s12, 0 }
  0xd7   : > { %s2841_s0 = sld [smem:[#allocation22_spill]] (!%p2840_p7)  ;;  %s2842_s3 = sld [smem:[#allocation28_spill]] (!%p2840_p7) }
  0xd8   : > { %451 = sbr.rel (%p2840_p7) target bundleno = 1081 (0x439), region = 52 }
  0xdd   : > { %s2461_s29 = sand.u32 (!%p2840_p7), 1, %s2841_s0   ;;  %p2843_p10 = scmp.ne.s32.totalorder (!%p2840_p7), %s2842_s3, 0 }
  0xde   : > { %s2782_s26 = smul.u32 (!%p2840_p7), 24, %s2461_s29  ;;  %s454_s28 = scalar_lea.sflag (!%p2840_p7), [#allocation4], %s2461_s29 }
  0xe0   : > { %s2467_s25 = scalar_lea.vmem [#allocation3], %s2782_s26 }
  0xe1   : > { %1986 = dma.done.wait (%p2843_p10), %s454_s28, 384  }
  0xe2   : > { %1988 = vsyncadd (%p2843_p10), %s454_s28, 4294966912  ;;  %s462_s15 = sand.u32 1, %s2177_s20   ;;  %s1582_s1 = smul.u32 384, %s2461_s29 }
  0xe3   : > { %s463_s5 = scalar_lea.sflag [#allocation7], %s462_s15 }
  0xe4   : > { %s2475_s9 = scalar_lea.vmem [#allocation6], %s1582_s1 }
  0xe5   : > { %1990 = dma.done.wait (%p2843_p10), %s463_s5, 6160  }
  0xe6   : > { %1992 = vsyncadd (%p2843_p10), %s463_s5, 4294961136  ;;  %s1309_s2 = sshll.u32 %s2461_s29, 8  ;;  %s480_s4 = scalar_lea.sflag [#allocation10], %s462_s15 }
  0xe7   : > { %s2483_s13 = scalar_lea.vmem [#allocation9], %s1309_s2 }
  0xe8   : > { %1994 = dma.done.wait (%p2843_p10), %s480_s4, 4096  }
  0xe9   : > { %1996 = vsyncadd (%p2843_p10), %s480_s4, 4294963200  ;;  %s2490_s20 = sand.u32 1, %s2015_s10  }
  0xea   : > { %s1310_s27 = sshll.u32 %s2490_s20, 7 }
  0xeb   : > { %s2493_s22 = scalar_lea.vmem [#allocation11], %s1310_s27 }
  0xec   : > { %1998 = dma.done.wait (%p2384_p8), %s480_s4, 2048  }
  0xed   : > { %2000 = vsyncadd (%p2384_p8), %s480_s4, 4294965248  ;;  %s2844_s12 = sld [smem:[#allocation25_spill]]  ;;  %s1311_s0 = sshll.u32 %s2490_s20, 3 }
  0xee   : > { %s2845_s15 = sld [smem:[#allocation38_spill]]  ;;  %s2846_s16 = sld [smem:[#allocation41_spill]] }
  0xef   : > { %s2847_s21 = sld [smem:[#allocation42_spill]]  ;;  %s2848_s17 = smul.u32 24, %s2461_s29 }
  0xf0   : > { %s2524_s14 = scalar_lea.vmem [#allocation13], %s1311_s0  ;;  %s2849_s3 = sld [smem:[#allocation24_spill]] }
  0xf1   : > { %s2522_s24 = scalar_lea.vmem [#allocation12], %s2848_s17 }
  0xf3   : > { %p562_p5 = scmp.lt.s32.totalorder %s2844_s12, 1 }
  0xf5   : > { %s2882_s12 = smov (!%p562_p5, %s2844_s12), 1 }
  0xf6   : > { %s564_s1 = scalar_lea.vmem %s2845_s15, %s2882_s12  ;;  %s1312_s5 = sshll.u32 %s2882_s12, 1 }
  0xf7   : > { %s2512_s4 = scalar_lea.vmem %s2846_s16, %s1312_s5  ;;  %s1313_s8 = sshll.u32 %s2882_s12, 3 }
  0xf8   : > { %s2518_s18 = scalar_lea.vmem %s2847_s21, %s1313_s8  ;;  %p1314_p8 = scmp.ne.s32.totalorder %s2849_s3, 0 }
  0xf9   : > { %v596_v0 = vld [vmem:[%s2475_s9 + $0x80] sm:$0xff] (!%p1314_p8)  ;;  %v597_v1 = vld [vmem:[%s2475_s9 + $0x88] sm:$0xff] (!%p1314_p8)  ;;  %v2063_v5 = vmov (!%p1314_p8), 0.0|0.0   ;;  %vm2064_vm0 = vmmov (!%p1314_p8), 0   ;;  %v2065_v8 = vmov (!%p1314_p8), 0.0   ;;  %v598_v11 = vld [vmem:[%s2475_s9 + $0x90] sm:$0xff] (!%p1314_p8) }
  0xfa   : > { %576 = sbr.rel (%p1314_p8) target bundleno = 795 (0x31b), region = 76  ;;  %v580_v2 = vld [vmem:[%s2475_s9] sm:$0xff] (!%p1314_p8)  ;;  %v1464_v3 = vpack.c.bf16 (!%p1314_p8), %v597_v1, %v596_v0  ;;  %v581_v4 = vld [vmem:[%s2475_s9 + $0x8] sm:$0xff] (!%p1314_p8)  ;;  %1496 = vmatprep.subr.bf16.mxu1 (!%p1314_p8), %v2063_v5  ;;  %1426 = vmatprep.mubr.msk.f32.mxu1 (!%p1314_p8), %vm2064_vm0, %v2065_v8  ;;  %v599_v12 = vld [vmem:[%s2475_s9 + $0x98] sm:$0xff] (!%p1314_p8)  ;;  %s2851_s26 = scalar_lea.vmem (!%p1314_p8), [#allocation8], %s2461_s29 }
  0xfb   : > { %v612_v6 = vld [vmem:[%s2475_s9 + $0x100] sm:$0xff] (!%p1314_p8)  ;;  %v613_v7 = vld [vmem:[%s2475_s9 + $0x108] sm:$0xff] (!%p1314_p8)  ;;  %v1466_v9 = vpack.c.bf16 (!%p1314_p8), %v581_v4, %v580_v2  ;;  %v582_v13 = vld [vmem:[%s2475_s9 + $0x10] sm:$0xff] (!%p1314_p8)  ;;  %v1468_v14 = vpack.c.bf16 (!%p1314_p8), %v599_v12, %v598_v11 }
  0xfc   : > { %v1497_v10 = vpack.c.bf16 (!%p1314_p8), %v613_v7, %v612_v6  ;;  %1465 = vmatprep.subr.bf16.mxu0 (!%p1314_p8), %v1464_v3  ;;  %v583_v15 = vld [vmem:[%s2475_s9 + $0x18] sm:$0xff] (!%p1314_p8)  ;;  %v614_v16 = vld [vmem:[%s2475_s9 + $0x110] sm:$0xff] (!%p1314_p8)  ;;  %v600_v20 = vld [vmem:[%s2475_s9 + $0xa0] sm:$0xff] (!%p1314_p8) }
  0xfd   : > { %v615_v17 = vld [vmem:[%s2475_s9 + $0x118] sm:$0xff] (!%p1314_p8)  ;;  %1467 = vmatpush3.bf16.msra.mxu0 (!%p1314_p8), %v1466_v9  ;;  %v1470_v18 = vpack.c.bf16 (!%p1314_p8), %v583_v15, %v582_v13  ;;  %v601_v21 = vld [vmem:[%s2475_s9 + $0xa8] sm:$0xff] (!%p1314_p8)  ;;  %v584_v22 = vld [vmem:[%s2475_s9 + $0x20] sm:$0xff] (!%p1314_p8) }
  0xfe   : > { %1498 = vmatpush3.bf16.msra.mxu1 (!%p1314_p8), %v1497_v10  ;;  %v1500_v19 = vpack.c.bf16 (!%p1314_p8), %v615_v17, %v614_v16  ;;  %1469 = vmatprep.subr.bf16.mxu0 (!%p1314_p8), %v1468_v14  ;;  %v1472_v23 = vpack.c.bf16 (!%p1314_p8), %v601_v21, %v600_v20  ;;  %v585_v24 = vld [vmem:[%s2475_s9 + $0x28] sm:$0xff] (!%p1314_p8)  ;;  %v616_v25 = vld [vmem:[%s2475_s9 + $0x120] sm:$0xff] (!%p1314_p8)  ;;  %v602_v27 = vld [vmem:[%s2475_s9 + $0xb0] sm:$0xff] (!%p1314_p8) }
  0xff   : > { %1499 = vmatprep.subr.bf16.mxu1 (!%p1314_p8), %v2063_v5  ;;  %v617_v26 = vld [vmem:[%s2475_s9 + $0x128] sm:$0xff] (!%p1314_p8)  ;;  %v603_v28 = vld [vmem:[%s2475_s9 + $0xb8] sm:$0xff] (!%p1314_p8)  ;;  %v1474_v29 = vpack.c.bf16 (!%p1314_p8), %v585_v24, %v584_v22  ;;  %v586_v31 = vld [vmem:[%s2475_s9 + $0x30] sm:$0xff] (!%p1314_p8) }
 0x100   : > { %v1503_v30 = vpack.c.bf16 (!%p1314_p8), %v617_v26, %v616_v25  ;;  %v1476_v32 = vpack.c.bf16 (!%p1314_p8), %v603_v28, %v602_v27  ;;  %v587_v33 = vld [vmem:[%s2475_s9 + $0x38] sm:$0xff] (!%p1314_p8)  ;;  %v618_v34 = vld [vmem:[%s2475_s9 + $0x130] sm:$0xff] (!%p1314_p8)  ;;  %v604_v36 = vld [vmem:[%s2475_s9 + $0xc0] sm:$0xff] (!%p1314_p8) }
 0x101   : > { %1471 = vmatpush3.bf16.msra.mxu0 %v1470_v18  ;;  %v619_v35 = vld [vmem:[%s2475_s9 + $0x138] sm:$0xff]  ;;  %v605_v37 = vld [vmem:[%s2475_s9 + $0xc8] sm:$0xff]  ;;  %v1478_v38 = vpack.c.bf16 %v587_v33, %v586_v31  ;;  %v588_v40 = vld [vmem:[%s2475_s9 + $0x40] sm:$0xff] }
 0x102   : > { %1501 = vmatpush3.bf16.msra.mxu1 %v1500_v19  ;;  %1473 = vmatprep.subr.bf16.mxu0 %v1472_v23  ;;  %v1506_v39 = vpack.c.bf16 %v619_v35, %v618_v34  ;;  %v1480_v41 = vpack.c.bf16 %v605_v37, %v604_v36  ;;  %v589_v42 = vld [vmem:[%s2475_s9 + $0x48] sm:$0xff]  ;;  %v620_v43 = vld [vmem:[%s2475_s9 + $0x140] sm:$0xff]  ;;  %v606_v45 = vld [vmem:[%s2475_s9 + $0xd0] sm:$0xff] }
 0x103   : > { %1502 = vmatprep.subr.bf16.mxu1 %v2063_v5  ;;  %v621_v44 = vld [vmem:[%s2475_s9 + $0x148] sm:$0xff]  ;;  %v607_v46 = vld [vmem:[%s2475_s9 + $0xd8] sm:$0xff]  ;;  %v1482_v48 = vpack.c.bf16 %v589_v42, %v588_v40  ;;  %v590_v50 = vld [vmem:[%s2475_s9 + $0x50] sm:$0xff] }
 0x104   : > { %v578_v47 = vld [vmem:[%s2467_s25 + $0x8] sm:$0xff]  ;;  %v1509_v49 = vpack.c.bf16 %v621_v44, %v620_v43  ;;  %v1484_v51 = vpack.c.bf16 %v607_v46, %v606_v45  ;;  %v608_v55 = vld [vmem:[%s2475_s9 + $0xe0] sm:$0xff]  ;;  %v609_v56 = vld [vmem:[%s2475_s9 + $0xe8] sm:$0xff] }
 0x105   : > { %1475 = vmatpush3.bf16.msra.mxu0 %v1474_v29  ;;  %v591_v52 = vld [vmem:[%s2475_s9 + $0x58] sm:$0xff]  ;;  %v622_v53 = vld [vmem:[%s2475_s9 + $0x150] sm:$0xff]  ;;  %692 = vmatprep.mubr.f32.mxu0 %v578_v47  ;;  %v592_v59 = vld [vmem:[%s2475_s9 + $0x60] sm:$0xff]  ;;  %v1488_v60 = vpack.c.bf16 %v609_v56, %v608_v55 }
 0x106   : > { %1504 = vmatpush3.bf16.msra.mxu1 %v1503_v30  ;;  %1477 = vmatprep.subr.bf16.mxu0 %v1476_v32  ;;  %v623_v54 = vld [vmem:[%s2475_s9 + $0x158] sm:$0xff]  ;;  %v1486_v57 = vpack.c.bf16 %v591_v52, %v590_v50  ;;  %v593_v61 = vld [vmem:[%s2475_s9 + $0x68] sm:$0xff]  ;;  %v624_v62 = vld [vmem:[%s2475_s9 + $0x160] sm:$0xff] }
 0x107   : > { %1505 = vmatprep.subr.bf16.mxu1 %v2063_v5  ;;  %v1512_v58 = vpack.c.bf16 %v623_v54, %v622_v53  ;;  %v625_v63 = vld [vmem:[%s2475_s9 + $0x168] sm:$0xff]  ;;  %v610_v0 = vld [vmem:[%s2475_s9 + $0xf0] sm:$0xff]  ;;  %v611_v1 = vld [vmem:[%s2475_s9 + $0xf8] sm:$0xff]  ;;  %v1490_v2 = vpack.c.bf16 %v593_v61, %v592_v59 }
 0x108   : > { %v1515_v3 = vpack.c.bf16 %v625_v63, %v624_v62  ;;  %v594_v4 = vld [vmem:[%s2475_s9 + $0x70] sm:$0xff]  ;;  %v1492_v6 = vpack.c.bf16 %v611_v1, %v610_v0  ;;  %v595_v7 = vld [vmem:[%s2475_s9 + $0x78] sm:$0xff]  ;;  %v806_v18 = vld [vmem:[%s2483_s13] sm:$0xff] }
 0x109   : > { %1479 = vmatpush3.bf16.msra.mxu0 %v1478_v38  ;;  %v626_v9 = vld [vmem:[%s2475_s9 + $0x170] sm:$0xff]  ;;  %v627_v10 = vld [vmem:[%s2475_s9 + $0x178] sm:$0xff]  ;;  %v1494_v11 = vpack.c.bf16 %v595_v7, %v594_v4  ;;  %v810_v23 = vld [vmem:[%s2483_s13 + $0x20] sm:$0xff] }
 0x10a   : > { %1507 = vmatpush3.bf16.msra.mxu1 %v1506_v39  ;;  %1481 = vmatprep.subr.bf16.mxu0 %v1480_v41  ;;  %v1518_v12 = vpack.c.bf16 %v627_v10, %v626_v9  ;;  %v577_v13 = vld [vmem:[%s2467_s25] sm:$0xff]  ;;  %v579_v14 = vld [vmem:[%s2467_s25 + $0x10] sm:$0xff] }
 0x10b   : > { %1508 = vmatprep.subr.bf16.mxu1 %v2063_v5  ;;  %v807_v15 = vld [vmem:[%s2483_s13 + $0x8] sm:$0xff]  ;;  %v809_v16 = vld [vmem:[%s2483_s13 + $0x18] sm:$0xff]  ;;  %v814_v28 = vld [vmem:[%s2483_s13 + $0x40] sm:$0xff] }
 0x10c   : > { %v1520_v17 = vpack.c.bf16 %v809_v16, %v807_v15  ;;  %v811_v20 = vld [vmem:[%s2483_s13 + $0x28] sm:$0xff]  ;;  %v813_v21 = vld [vmem:[%s2483_s13 + $0x38] sm:$0xff]  ;;  %v816_v29 = vld [vmem:[%s2483_s13 + $0x50] sm:$0xff] }
 0x10d   : > { %1483 = vmatpush3.bf16.msra.mxu0 %v1482_v48  ;;  %v1524_v22 = vpack.c.bf16 %v813_v21, %v811_v20  ;;  %v815_v25 = vld [vmem:[%s2483_s13 + $0x48] sm:$0xff]  ;;  %v817_v26 = vld [vmem:[%s2483_s13 + $0x58] sm:$0xff]  ;;  %v1530_v30 = vpack.c.bf16 %v816_v29, %v814_v28  ;;  %v818_v34 = vld [vmem:[%s2483_s13 + $0x60] sm:$0xff]  ;;  %v840_v29 = vlaneseq }
 0x10e   : > { %1510 = vmatpush3.bf16.msra.mxu1 %v1509_v49  ;;  %1485 = vmatprep.subr.bf16.mxu0 %v1484_v51  ;;  %v1528_v27 = vpack.c.bf16 %v817_v26, %v815_v25  ;;  %v819_v31 = vld [vmem:[%s2483_s13 + $0x68] sm:$0xff]  ;;  %v821_v32 = vld [vmem:[%s2483_s13 + $0x78] sm:$0xff]  ;;  %v820_v35 = vld [vmem:[%s2483_s13 + $0x70] sm:$0xff] }
 0x10f   : > { %1511 = vmatprep.subr.bf16.mxu1 %v2063_v5  ;;  %v1532_v33 = vpack.c.bf16 %v821_v32, %v819_v31  ;;  %v1534_v36 = vpack.c.bf16 %v820_v35, %v818_v34  ;;  %v823_v37 = vld [vmem:[%s2483_s13 + $0x88] sm:$0xff]  ;;  %v825_v38 = vld [vmem:[%s2483_s13 + $0x98] sm:$0xff]  ;;  %v822_v40 = vld [vmem:[%s2483_s13 + $0x80] sm:$0xff] }
 0x110   : > { %v1536_v39 = vpack.c.bf16 %v825_v38, %v823_v37  ;;  %v824_v41 = vld [vmem:[%s2483_s13 + $0x90] sm:$0xff]  ;;  %v827_v43 = vld [vmem:[%s2483_s13 + $0xa8] sm:$0xff]  ;;  %v829_v44 = vld [vmem:[%s2483_s13 + $0xb8] sm:$0xff] }
 0x111   : > { %1487 = vmatpush3.bf16.msra.mxu0 %v1486_v57  ;;  %v1538_v42 = vpack.c.bf16 %v824_v41, %v822_v40  ;;  %v1540_v45 = vpack.c.bf16 %v829_v44, %v827_v43  ;;  %v826_v46 = vld [vmem:[%s2483_s13 + $0xa0] sm:$0xff]  ;;  %v828_v47 = vld [vmem:[%s2483_s13 + $0xb0] sm:$0xff]  ;;  %v831_v49 = vld [vmem:[%s2483_s13 + $0xc8] sm:$0xff] }
 0x112   : > { %1513 = vmatpush3.bf16.msra.mxu1 %v1512_v58  ;;  %1489 = vmatprep.subr.bf16.mxu0 %v1488_v60  ;;  %v1542_v48 = vpack.c.bf16 %v828_v47, %v826_v46  ;;  %v833_v50 = vld [vmem:[%s2483_s13 + $0xd8] sm:$0xff]  ;;  %v830_v51 = vld [vmem:[%s2483_s13 + $0xc0] sm:$0xff]  ;;  %v832_v53 = vld [vmem:[%s2483_s13 + $0xd0] sm:$0xff] }
 0x113   : > { %1514 = vmatprep.subr.bf16.mxu1 %v2063_v5  ;;  %v1544_v52 = vpack.c.bf16 %v833_v50, %v831_v49  ;;  %v835_v54 = vld [vmem:[%s2483_s13 + $0xe8] sm:$0xff]  ;;  %v837_v55 = vld [vmem:[%s2483_s13 + $0xf8] sm:$0xff]  ;;  %v1546_v56 = vpack.c.bf16 %v832_v53, %v830_v51  ;;  %v834_v58 = vld [vmem:[%s2483_s13 + $0xe0] sm:$0xff] }
 0x114   : > { %v1548_v57 = vpack.c.bf16 %v837_v55, %v835_v54  ;;  %v836_v59 = vld [vmem:[%s2483_s13 + $0xf0] sm:$0xff]  ;;  %v1316_v25 = vld [vmem:[%s2851_s26] ss:$0 sm:$0xff] }
 0x115   : > { %1491 = vmatpush3.bf16.msra.mxu0 %v1490_v2  ;;  %v1550_v60 = vpack.c.bf16 %v836_v59, %v834_v58  ;;  %v838_v32 = vld [vmem:[%s2512_s4] sm:$0x3] }
 0x116   : > { %1516 = vmatpush3.bf16.msra.mxu1 %v1515_v3  ;;  %1493 = vmatprep.subr.bf16.mxu0 %v1492_v6  ;;  %v927_v43 = vld [vmem:[%s2518_s18] sm:$0xff] }
 0x117   : > { %1517 = vmatprep.subr.bf16.mxu1 %v2063_v5  ;;  %v808_v5 = vld [vmem:[%s2483_s13 + $0x10] sm:$0xff] }
 0x118   : > { %v1522_v19 = vpack.c.bf16 %v808_v5, %v806_v18 }
 0x119   : > { %1495 = vmatpush3.bf16.msra.mxu0 %v1494_v11 }
 0x11a   : > { %1519 = vmatpush3.bf16.msra.mxu1 %v1518_v12  ;;  %1521 = vmatprep.subr.bf16.mxu0 %v1520_v17 }
 0x11c   : > { %693 = vmatmul.mubr.f32.vlgmr.msra.gmra.mrb[0].mxu0 %v577_v13 }
 0x11d   : > { %1427 = vmatmul.mubr.f32.vlgmr.msra.gmra.mrb[0].mxu1 %v579_v14  ;;  %914 = vmatprep.mubr.f32.mxu0 %v2065_v8  ;;  %v812_v8 = vld [vmem:[%s2483_s13 + $0x30] sm:$0xff] }
 0x11e   : > { %1523 = vmatpush1.bf16.msra.mxu0 %v1522_v19  ;;  %v1526_v24 = vpack.c.bf16 %v812_v8, %v810_v23  ;;  %v1315_v8 = vld [vmem:[%s564_s1] ss:$0 sm:$0xff] }
 0x11f   : > { %1525 = vmatprep.subr.bf16.mxu0 %v1524_v22 }
 0x122   : > { %1527 = vmatpush1.bf16.msra.mxu0 %v1526_v24 }
 0x123   : > { %1529 = vmatprep.subr.bf16.mxu0 %v1528_v27 }
 0x126   : > { %1531 = vmatpush1.bf16.msra.mxu0 %v1530_v30  ;;  %v841_v30 = vshrl.u32 %v840_v29, 7 }
 0x127   : > { %1533 = vmatprep.subr.bf16.mxu0 %v1532_v33 }
 0x128   : > { %v842_v31 = vsub.s32 0, %v841_v30  ;;  %v846_v33 = vsub.s32 1, %v841_v30 }
 0x12a   : > { %1535 = vmatpush1.bf16.msra.mxu0 %v1534_v36  ;;  %v843_v34 = vrot.slane %v838_v32, %v842_v31  ;;  %v847_v35 = vrot.slane %v838_v32, %v846_v33 }
 0x12b   : > { %1537 = vmatprep.subr.bf16.mxu0 %v1536_v39 }
 0x12e   : > { %1539 = vmatpush1.bf16.msra.mxu0 %v1538_v42 }
 0x12f   : > { %1541 = vmatprep.subr.bf16.mxu0 %v1540_v45 }
 0x132   : > { %1543 = vmatpush1.bf16.msra.mxu0 %v1542_v48 }
 0x133   : > { %1545 = vmatprep.subr.bf16.mxu0 %v1544_v52 }
 0x136   : > { %1547 = vmatpush1.bf16.msra.mxu0 %v1546_v56 }
 0x137   : > { %1549 = vmatprep.subr.bf16.mxu0 %v1548_v57 }
 0x13a   : > { %1551 = vmatpush1.bf16.msra.mxu0 %v1550_v60 }
 0x1ef   : > { %v1357_v61 = vpop.f32.mrb[0].mxu0 }
 0x1f0   : > { %v764_v62 = vpop.f32.mrb[0].mxu1  ;;  %v1358_v63 = vpop.f32.mrb[1].mxu0 }
 0x1f1   : > { %v1428_v0 = vpop.f32.mrb[1].mxu1  ;;  %v1359_v1 = vadd.f32 %v1358_v63, %v1357_v61 }
 0x1f3   : > { %v765_v2 = vadd.f32 %v1359_v1, %v764_v62 }
 0x1f5   : > { %v768_v3 = vrot.slane %v765_v2, 4  ;;  %v774_v4 = vmul.f32 %v765_v2, %v765_v2 }
 0x1f7   : > { %v769_v6 = vadd.f32 %v768_v3, %v765_v2  ;;  %v775_v7 = vrot.slane %v774_v4, 4 }
 0x1f9   : > { %v770_v9 = vrot.slane %v769_v6, 2  ;;  %v776_v10 = vadd.f32 %v775_v7, %v774_v4 }
 0x1fb   : > { %v771_v11 = vadd.f32 %v770_v9, %v769_v6  ;;  %v777_v12 = vrot.slane %v776_v10, 2 }
 0x1fd   : > { %v772_v13 = vrot.slane %v771_v11, 1  ;;  %v778_v14 = vadd.f32 %v777_v12, %v776_v10 }
 0x1ff   : > { %v773_v15 = vadd.f32 %v772_v13, %v771_v11  ;;  %v779_v16 = vrot.slane %v778_v14, 1 }
 0x201   : > { %v780_v17 = vadd.f32 %v779_v16, %v778_v14  ;;  %v781_v18 = vmul.f32 0.125, %v773_v15 }
 0x203   : > { %v782_v5 = vmul.f32 0.125, %v780_v17  ;;  %v783_v19 = vmul.f32 %v781_v18, %v781_v18  ;;  %v785_v22 = vsub.f32 %v765_v2, %v781_v18 }
 0x205   : > { %v784_v20 = vsub.f32 %v782_v5, %v783_v19 }
 0x207   : > { %v786_v21 = vadd.f32 1e-05, %v784_v20 }
 0x209   : > { %1723 = vrsqrt.f32 %v786_v21 }
 0x213   : > { %v1724_v23 = vpop.eup %1723 }
 0x214   : > { %v788_v24 = vmul.f32 %v1724_v23, %v785_v22 }
 0x216   : > { %v796_v26 = vmul.f32 %v1315_v8, %v788_v24 }
 0x218   : > { %v804_v27 = vadd.f32 %v1316_v25, %v796_v26 }
 0x21a   : > { %1725 = vtanh.f32 %v804_v27 }
 0x224   : > { %v1726_v28 = vpop.eup %1725 }
 0x225   : > { %915 = vmatmul.mubr.f32.vlgmr.msra.gmra.mrb[2].mxu0 %v1726_v28 }
 0x2f8   : > { %v916_v36 = vpop.f32.mrb[2].mxu0 }
 0x2f9   : > { %v917_v37 = vadd.f32 %v916_v36, %v843_v34  ;;  %v918_v38 = vpop.f32.mrb[3].mxu0 }
 0x2fa   : > { %v919_v39 = vadd.f32 %v918_v38, %v847_v35 }
 0x2fb   : > { %932 = vst [vmem:[%s2522_s24 + $0x8] sm:$0xff] %v917_v37 }
 0x2fc   : > { %v1317_v40 = vmul.f32 -1.442695, %v919_v39 }
 0x2fe   : > { %1727 = vpow2.f32 %v1317_v40 }
 0x308   : > { %v1728_v41 = vpop.eup %1727 }
 0x309   : > { %v924_v42 = vadd.f32 1.0, %v1728_v41 }
 0x30b   : > { %1729 = vrcp.f32 %v924_v42 }
 0x315   : > { %v1730_v44 = vpop.eup %1729 }
 0x316   : > { %v928_v45 = vmul.f32 %v1730_v44, %v927_v43  ;;  %933 = vst [vmem:[%s2522_s24 + $0x10] sm:$0xff] %v1730_v44 }
 0x318   : > { %v929_v46 = vadd.f32 %v928_v45, %v917_v37 }
 0x31a   : > { %930 = vst [vmem:[#allocation2] sm:$0xff] %v929_v46  ;;  %931 = vst [vmem:[%s2522_s24] sm:$0xff] %v929_v46 }
 0x31b PF: > { %v935_v47 = vld [vmem:[%s2493_s22] sm:$0xff]  ;;  %v936_v48 = vld [vmem:[%s2493_s22 + $0x8] sm:$0xff]  ;;  %v937_v49 = vld [vmem:[%s2493_s22 + $0x10] sm:$0xff]  ;;  %v2066_v50 = vmov 0.0|0.0   ;;  %vm2067_vm1 = vmmov 0   ;;  %v2068_v53 = vmov 0.0  }
 0x31c   : > { %1552 = vmatprep.subr.bf16.mxu0 %v2066_v50  ;;  %v1553_v51 = vpack.c.bf16 %v936_v48, %v935_v47  ;;  %v938_v52 = vld [vmem:[%s2493_s22 + $0x18] sm:$0xff]  ;;  %1461 = vmatprep.mubr.msk.f32.mxu0 %vm2067_vm1, %v2068_v53  ;;  %v939_v55 = vld [vmem:[%s2493_s22 + $0x20] sm:$0xff]  ;;  %v940_v56 = vld [vmem:[%s2493_s22 + $0x28] sm:$0xff]  ;;  %s2852_s18 = sld [smem:[#allocation25_spill]]  ;;  %s2853_s25 = sld [smem:[#allocation29_spill]] }
 0x31d   : > { %v1556_v54 = vpack.c.bf16 %v938_v52, %v937_v49  ;;  %v1559_v57 = vpack.c.bf16 %v940_v56, %v939_v55  ;;  %v941_v58 = vld [vmem:[%s2493_s22 + $0x30] sm:$0xff]  ;;  %v942_v59 = vld [vmem:[%s2493_s22 + $0x38] sm:$0xff]  ;;  %v943_v61 = vld [vmem:[%s2493_s22 + $0x40] sm:$0xff]  ;;  %s1048_s8 = sshll.u32 %s2522_s24, 4  ;;  %s2854_s0 = sld [smem:[#allocation44_spill]]  ;;  %s1049_s8 = int_to_ptr.vmem [resolvable:$true] %s1048_s8 }
 0x31e   : > { %1554 = vmatpush3.bf16.msra.mxu0 %v1553_v51  ;;  %v1562_v60 = vpack.c.bf16 %v942_v59, %v941_v58  ;;  %v944_v62 = vld [vmem:[%s2493_s22 + $0x48] sm:$0xff]  ;;  %v945_v0 = vld [vmem:[%s2493_s22 + $0x50] sm:$0xff]  ;;  %v946_v1 = vld [vmem:[%s2493_s22 + $0x58] sm:$0xff]  ;;  %s1029_s15 = scalar_lea.sflag [#allocation5], %s2461_s29  ;;  %s1885_s1 = scalar_lea.vmem %s1049_s8, 384 }
 0x31f   : > { %1555 = vmatprep.subr.bf16.mxu0 %v2066_v50  ;;  %v1565_v63 = vpack.c.bf16 %v944_v62, %v943_v61  ;;  %v1568_v2 = vpack.c.bf16 %v946_v1, %v945_v0  ;;  %v947_v3 = vld [vmem:[%s2493_s22 + $0x60] sm:$0xff]  ;;  %v948_v4 = vld [vmem:[%s2493_s22 + $0x68] sm:$0xff]  ;;  %v949_v7 = vld [vmem:[%s2493_s22 + $0x70] sm:$0xff]  ;;  %p1886_p13 = scmp.ne.s32.totalorder %s1049_s8, %s1885_s1 }
 0x320   : > { %v1571_v6 = vpack.c.bf16 %v948_v4, %v947_v3  ;;  %v950_v9 = vld [vmem:[%s2493_s22 + $0x78] sm:$0xff]  ;;  %s2069_s22 = smov [#allocation12]  }
 0x321   : > { %v1574_v10 = vpack.c.bf16 %v950_v9, %v949_v7  ;;  %v934_v11 = vld [vmem:[#allocation2] sm:$0xff]  ;;  %s1889_s5 = sshll.u32 %s2069_s22, 4  ;;  %s1890_s5 = int_to_ptr.vmem [resolvable:$false] %s1889_s5 }
 0x322   : > { %1557 = vmatpush3.bf16.msra.mxu0 %v1556_v54  ;;  %s1583_s9 = smul.u32 384, %s2852_s18  ;;  %p2855_p4 = scmp.ne.s32.totalorder %s2853_s25, 0 }
 0x323   : > { %1558 = vmatprep.subr.bf16.mxu0 %v2066_v50  ;;  %s1891_s2 = scalar_lea.vmem %s1890_s5, 768  ;;  %p1892_p11 = scmp.lt.s32.totalorder %s1049_s8, %s1890_s5 }
 0x324   : > { %s2653_s28 = scalar_lea.hbm %s2854_s0, %s1583_s9  ;;  %p1887_p3 = pnand %p1886_p13, %p2855_p4 }
 0x325   : > { %p1893_p1 = scmp.lt.s32.totalorder %s1891_s2, %s1885_s1 }
 0x326   : > { %1560 = vmatpush3.bf16.msra.mxu0 %v1559_v57  ;;  %p1888_p6 = pneg %p1887_p3 }
 0x327   : > { %1561 = vmatprep.subr.bf16.mxu0 %v2066_v50  ;;  %p1894_p2 = por %p1893_p1, %p1892_p11 }
 0x329   : > { %p1895_p9 = pnand %p1894_p2, %p1888_p6 }
 0x32a   : > { %1563 = vmatpush3.bf16.msra.mxu0 %v1562_v60 }
 0x32b   : > { %1564 = vmatprep.subr.bf16.mxu0 %v2066_v50 }
 0x32e   : > { %1566 = vmatpush3.bf16.msra.mxu0 %v1565_v63 }
 0x32f   : > { %1567 = vmatprep.subr.bf16.mxu0 %v2066_v50 }
 0x332   : > { %1569 = vmatpush3.bf16.msra.mxu0 %v1568_v2 }
 0x333   : > { %1570 = vmatprep.subr.bf16.mxu0 %v2066_v50 }
 0x336   : > { %1572 = vmatpush3.bf16.msra.mxu0 %v1571_v6 }
 0x337   : > { %1573 = vmatprep.subr.bf16.mxu0 %v2066_v50 }
 0x33a   : > { %1575 = vmatpush3.bf16.msra.mxu0 %v1574_v10 }
 0x33d   : > { %1462 = vmatmul.mubr.f32.vlgmr.msra.gmra.mrb[0].mxu0 %v934_v11 }
 0x33e   : > { %1898 = shalt.err (!%p1895_p9)
}
 0x33f   : > { %s1899_s24 = scalar_lea.hbm %s2653_s28, 384  ;;  %s1903_s16 = scalar_lea.hbm %s2854_s0, 768 }
 0x340   : > { %p1900_p0 = scmp.ne.s32.totalorder %s2653_s28, %s1899_s24  ;;  %p1904_p10 = scmp.lt.u32.totalorder %s2653_s28, %s2854_s0 }
 0x341   : > { %p1905_p5 = scmp.lt.u32.totalorder %s1903_s16, %s1899_s24  ;;  %p1907_p13 = scmp.lt.u32.totalorder %s1899_s24, %s2653_s28 }
 0x342   : > { %p1901_p12 = pnand %p1900_p0, %p2855_p4 }
 0x343   : > { %p1906_p8 = por %p1905_p5, %p1904_p10 }
 0x344   : > { %p1902_p7 = pneg %p1901_p12 }
 0x345   : > { %p1908_p3 = por %p1907_p13, %p1906_p8 }
 0x347   : > { %p1909_p6 = pnand %p1908_p3, %p1902_p7 }
 0x349   : > { %1912 = shalt.err (!%p1909_p6)
}
 0x34a   : > { %s2856_s7 = sld [smem:[#allocation24_spill]]  ;;  %s1584_s17 = smul.u32 3, %s2852_s18 }
 0x34b   : > { %1595 = dma.vmem_to_hbm [thread:$0]  (%p2855_p4), %s1049_s8, 384, %s2653_s28, %s1029_s15  }
 0x34c   : > { %s1063_s9 = sshll.u32 %s2524_s14, 4  ;;  %s2857_s12 = sld [smem:[#allocation45_spill]]  ;;  %s2681_s9 = int_to_ptr.vmem [resolvable:$true] %s1063_s9 }
 0x34d   : > { %s1034_s8 = scalar_lea.sflag [#allocation14], %s2490_s20  ;;  %s1913_s28 = scalar_lea.vmem %s2681_s9, 128 }
 0x34e   : > { %p1914_p4 = scmp.ne.s32.totalorder %s2681_s9, %s1913_s28  ;;  %p2859_p11 = scmp.ne.s32.totalorder %s2827_s6, 0 }
 0x34f   : > { %s2070_s18 = smov [#allocation13]  }
 0x350   : > { %s1059_s21 = sadd.s32 %s2856_s7, %s1584_s17  ;;  %p1915_p1 = pnand %p1914_p4, %p2859_p11 }
 0x351   : > { %s1321_s26 = sshll.u32 %s1059_s21, 7  ;;  %s1917_s15 = sshll.u32 %s2070_s18, 4  ;;  %s1918_s15 = int_to_ptr.vmem [resolvable:$false] %s1917_s15 }
 0x352   : > { %s2858_s1 = smov %s2857_s12  ;;  %s2679_s22 = scalar_lea.hbm %s2857_s12, %s1321_s26 }
 0x353   : > { %p1916_p2 = pneg %p1915_p1  ;;  %s1919_s5 = scalar_lea.vmem %s1918_s15, 256 }
 0x354   : > { %p1920_p9 = scmp.lt.s32.totalorder %s2681_s9, %s1918_s15  ;;  %p1921_p0 = scmp.lt.s32.totalorder %s1919_s5, %s1913_s28 }
 0x356   : > { %p1922_p12 = por %p1921_p0, %p1920_p9 }
 0x358   : > { %p1923_p7 = pnand %p1922_p12, %p1916_p2 }
 0x410   : > { %v1017_v12 = vpop.f32.mrb[0].mxu0 }
 0x411   : > { %v1318_v13 = vmul.f32 -1.442695, %v1017_v12  ;;  %v1463_v14 = vpop.f32.mrb[1].mxu0 }
 0x413   : > { %1731 = vpow2.f32 %v1318_v13 }
 0x41d   : > { %v1732_v15 = vpop.eup %1731 }
 0x41e   : > { %v1024_v16 = vadd.f32 1.0, %v1732_v15 }
 0x420   : > { %1733 = vrcp.f32 %v1024_v16 }
 0x42a   : > { %v1734_v17 = vpop.eup %1733 }
 0x42b   : > { %1027 = vst [vmem:[%s2524_s14] sm:$0xff] %v1734_v17 }
 0x42c   : > { %1926 = shalt.err (!%p1923_p7)
}
 0x42d   : > { %s1927_s14 = scalar_lea.hbm %s2679_s22, 128  ;;  %s1931_s24 = scalar_lea.hbm %s2858_s1, 768 }
 0x42e   : > { %p1928_p10 = scmp.ne.s32.totalorder %s2679_s22, %s1927_s14  ;;  %p1932_p13 = scmp.lt.u32.totalorder %s2679_s22, %s2858_s1 }
 0x42f   : > { %p1933_p3 = scmp.lt.u32.totalorder %s1931_s24, %s1927_s14  ;;  %p1935_p4 = scmp.lt.u32.totalorder %s1927_s14, %s2679_s22 }
 0x430   : > { %p1929_p5 = pnand %p1928_p10, %p2859_p11 }
 0x431   : > { %p1934_p6 = por %p1933_p3, %p1932_p13 }
 0x432   : > { %p1930_p8 = pneg %p1929_p5 }
 0x433   : > { %p1936_p1 = por %p1935_p4, %p1934_p6 }
 0x435   : > { %p1937_p2 = pnand %p1936_p1, %p1930_p8 }
 0x437   : > { %1940 = shalt.err (!%p1937_p2)
}
 0x438   : > { %1596 = dma.vmem_to_hbm [thread:$0]  (%p2859_p11), %s2681_s9, 128, %s2679_s22, %s1034_s8  }
 0x439 PF: > { %s2860_s16 = sld [smem:[#allocation21_spill]]  ;;  %s2861_s4 = sld [smem:[#allocation30_spill]] }
 0x43a   : > { %p1623_p9 = scmp.ge.s32.totalorder %s2051_s19, 2 }
 0x43f   : > { %s1075_s3 = sand.u32 1, %s2860_s16   ;;  %p2862_p0 = scmp.ne.s32.totalorder %s2861_s4, 0 }
 0x440   : > { %s1076_s7 = scalar_lea.sflag [#allocation5], %s1075_s3 }
 0x441   : > { %p1616_p12 = pnand %p1623_p9, %p2862_p0 }
 0x443   : > { %2002 = dma.done.wait (!%p1616_p12), %s1076_s7, 384  }
 0x444   : > { %2004 = vsyncadd (!%p1616_p12), %s1076_s7, 4294966912  ;;  %s2863_s17 = sld [smem:[#allocation33_spill]]  ;;  %s1084_s21 = sand.u32 1, %s2011_s30  }
 0x445   : > { %s1085_s6 = scalar_lea.sflag [#allocation14], %s1084_s21 }
 0x44a   : > { %p2864_p7 = scmp.ne.s32.totalorder %s2863_s17, 0 }
 0x44c   : > { %p1619_p10 = pnand %p1623_p9, %p2864_p7 }
 0x44e   : > { %2006 = dma.done.wait (!%p1619_p10), %s1085_s6, 128  }
 0x44f   : > { %2008 = vsyncadd (!%p1619_p10), %s1085_s6, 4294967168  ;;  %s35_s19 = sadd.s32 1, %s2051_s19   ;;  %s2865_s12 = sld [smem:[#allocation22_spill]] }
 0x450   : > { %p32_p11 = scmp.ge.s32.totalorder %s35_s19, 8   ;;  %s2866_s13 = sld [smem:[#allocation23_spill]] }
 0x451   : > { %s2867_s14 = sld [smem:[#allocation35_spill]]  ;;  %s2868_s15 = sld [smem:[#allocation26_spill]] }
 0x452   : > { %s2869_s16 = sld [smem:[#allocation27_spill]]  ;;  %s2870_s17 = sld [smem:[#allocation32_spill]] }
 0x453   : > { %s2871_s18 = sld [smem:[#allocation34_spill]]  ;;  %s2872_s30 = smov %s2015_s10 }
 0x454   : > { %s2873_s10 = smov %s2019_s11  ;;  %s2874_s11 = smov %s2412_s23 }
 0x455   :  { %34 = sbr.rel (!%p32_p11) target bundleno = 26 (0x1a), region = 175 }
 0x45c   :  { %1090 = vsyncpa [#allocation4], 1 }
 0x45d   :  { %1092 = vsyncpa [#allocation4 + $0x1], 1 }
 0x45e   :  { %1093 = vsyncpa [#allocation7], 1 }
 0x45f   :  { %1095 = vsyncpa [#allocation7 + $0x1], 1 }
 0x460   :  { %1096 = vsyncpa [#allocation10], 1 }
 0x461   :  { %1098 = vsyncpa [#allocation10 + $0x1], 1 }
 0x462   :  { %1099 = vsyncpa [#allocation5], 1 }
 0x463   :  { %1101 = vsyncpa [#allocation5 + $0x1], 1 }
 0x464   :  { %1102 = vsyncpa [#allocation14], 1 }
 0x465   :  { %1104 = vsyncpa [#allocation14 + $0x1], 1 }

</bundles_post_ra>
